<compile_context>
chip_gen: v7x
topology: tpu7x:2x2x1
jax: 0.10.0
libtpu: 0.0.40
codegen_flags: <defaults>
</compile_context>

<pallas_src>
import functools

import jax
import jax.numpy as jnp
from jax import lax
from jax.experimental import pallas as pl
from jax.experimental.pallas import tpu as pltpu


# ------------------------------- kernels -------------------------------------
def _br_stats_kernel(gb_ref, x_ref, ss_ref, s1_ref, s2_ref, *, eps, inv_count):
    """Per-channel batch statistics folded with gamma/beta into (scale, shift).

    gb_ref : (2, cb, 1)    stacked [gamma; beta] (f32, resident across HW axis)
    x_ref  : (N, cb, thw)  input tile (channels on sublanes, spatial on lanes)
    ss_ref : (2, cb, 1)    output: stacked [scale; shift] (f32)
    s1_ref : (1, cb, 1)    VMEM scratch: running sum(x)
    s2_ref : (1, cb, 1)    VMEM scratch: running sum(x*x)
    """
    h = pl.program_id(1)

    @pl.when(h == 0)
    def _():
        s1_ref[...] = jnp.zeros_like(s1_ref)
        s2_ref[...] = jnp.zeros_like(s2_ref)

    x = x_ref[...].astype(jnp.float32)
    s1_ref[...] += jnp.sum(x, axis=(0, 2), keepdims=True)
    s2_ref[...] += jnp.sum(x * x, axis=(0, 2), keepdims=True)

    @pl.when(h == pl.num_programs(1) - 1)
    def _():
        mean = s1_ref[...] * inv_count
        var = s2_ref[...] * inv_count - mean * mean
        var = jnp.maximum(var, 0.0)              # guard E[x^2]-mean^2 cancellation
        scale = gb_ref[0:1] * lax.rsqrt(var + eps)
        shift = gb_ref[1:2] - mean * scale
        ss_ref[0:1] = scale
        ss_ref[1:2] = shift


def _br_apply_kernel(p_ref, x_ref, o_ref):
    """Fused affine + PReLU:  out = PReLU(x * scale + shift).

    p_ref : (3, cb, 1)    stacked [scale; shift; alpha] (f32)
    x_ref : (N, cb, thw)  input tile
    o_ref : (N, cb, thw)  output tile (same dtype as input)
    """
    p = p_ref[...]
    x = x_ref[...].astype(jnp.float32)
    y = x * p[0:1] + p[1:2]
    o_ref[...] = jnp.where(y >= 0.0, y, p[2:3] * y).astype(o_ref.dtype)


# --------------------------- tiling / VMEM sizing -----------------------------
def _vmem_budget_bytes():
    """(tiling budget, compiler scoped-VMEM limit) derived from device VMEM."""
    try:
        cap = int(pltpu.get_tpu_info().vmem_capacity_bytes)
    except Exception:                      # no TPU info -> assume smallest (v7x)
        cap = 64 * 1024 * 1024
    budget = (cap * 7) // 10               # headroom for compiler temps / scratch
    limit = min((cap * 9) // 10, 112 * 1024 * 1024)
    return budget, limit


def _choose_tiles(N, C, HW, itemsize, budget_bytes):
    """Pick (c_pad, cb, hw_pad, t_hw) from the VMEM budget.

    Per grid step the pipeline holds double-buffered input + output blocks plus
    ~3 block-sized f32 temporaries created in the kernel body.
    """
    lane = 128
    sub = max(8, 32 // itemsize)           # sublane packing: f32 8, bf16 16, int8 32
    per_elem = 4 * itemsize + 3 * 4
    max_block = max(budget_bytes // per_elem, N * sub * lane)

    c_pad = pl.cdiv(C, sub) * sub
    hw128 = pl.cdiv(HW, lane) * lane

    # Channel block: a multiple of `sub` that divides c_pad; keep >= 2 channel
    # grid steps when possible (megacore) and leave room for a wide lane tile.
    lane_target = min(max(hw128, lane), 2048)
    cb_cap = max(sub, max_block // (N * lane_target))
    cb = c_pad if c_pad <= sub else sub
    for cand in range(sub, c_pad // 2 + 1, sub):
        if c_pad % cand == 0 and cand <= cb_cap:
            cb = cand

    # Lane tile: as wide as the budget allows (multiple of 128), capped at the
    # padded spatial extent.
    t_hw = max_block // (N * cb)
    t_hw = max(lane, (t_hw // lane) * lane)
    t_hw = min(t_hw, hw128, 16384)
    hw_pad = pl.cdiv(hw128, t_hw) * t_hw
    return c_pad, cb, hw_pad, t_hw


# --------------------------------- forward ------------------------------------
def br_forward(x_nchw, gamma, beta, alpha, *, eps=1e-3,
               running_mean=None, running_var=None):
    """Forward of module BR: BatchNorm2d(C, eps) followed by PReLU(C).

    If running_mean/running_var are None, BN uses batch statistics (training-
    mode forward, the nn.Module default); otherwise the provided running
    statistics are used (eval-mode forward).
    """
    N, C, H, W = x_nchw.shape
    HW = H * W
    itemsize = jnp.dtype(x_nchw.dtype).itemsize
    eps = float(eps)

    budget, vmem_limit = _vmem_budget_bytes()
    c_pad, cb, hw_pad, t_hw = _choose_tiles(N, C, HW, itemsize, budget)
    c_grid, hw_grid = c_pad // cb, hw_pad // t_hw

    # Free reshape of contiguous NCHW: H*W lands on the 128-lane axis,
    # channels on the sublane axis.  Zero-pad to the tile grid.
    x3 = x_nchw.reshape(N, C, HW)
    if hw_pad != HW or c_pad != C:
        x3 = jnp.pad(x3, ((0, 0), (0, c_pad - C), (0, hw_pad - HW)))

    def chan(p):                                     # (C,) -> (c_pad,) f32
        p = jnp.asarray(p, jnp.float32).reshape(C)
        return jnp.pad(p, (0, c_pad - C)) if c_pad != C else p

    gamma32, beta32, alpha32 = chan(gamma), chan(beta), chan(alpha)

    x_spec = pl.BlockSpec((N, cb, t_hw), lambda c, h: (0, c, h))

    def p_spec(k):
        return pl.BlockSpec((k, cb, 1), lambda c, h: (0, c, 0))

    if running_mean is None:
        # ---- pass 1: batch statistics -> per-channel (scale, shift) ---------
        gb = jnp.stack([gamma32, beta32]).reshape(2, c_pad, 1)
        ss = pl.pallas_call(
            functools.partial(_br_stats_kernel, eps=eps,
                              inv_count=1.0 / float(N * HW)),
            out_shape=jax.ShapeDtypeStruct((2, c_pad, 1), jnp.float32),
            grid_spec=pltpu.PrefetchScalarGridSpec(
                num_scalar_prefetch=0,
                grid=(c_grid, hw_grid),
                in_specs=[p_spec(2), x_spec],
                out_specs=p_spec(2),
                scratch_shapes=[pltpu.VMEM((1, cb, 1), jnp.float32),
                                pltpu.VMEM((1, cb, 1), jnp.float32)],
            ),
            compiler_params=pltpu.CompilerParams(
                dimension_semantics=("parallel", "arbitrary"),
                vmem_limit_bytes=vmem_limit),
            cost_estimate=pl.CostEstimate(
                flops=3 * N * C * HW + 10 * C,
                transcendentals=C,
                bytes_accessed=N * c_pad * hw_pad * itemsize + 16 * c_pad),
        )(gb, x3)
        params = jnp.concatenate([ss, alpha32.reshape(1, c_pad, 1)], axis=0)
    else:
        # ---- eval mode: fold running statistics in the wrapper ---------------
        rmean, rvar = chan(running_mean), chan(running_var)
        scale = gamma32 * lax.rsqrt(rvar + eps)
        shift = beta32 - rmean * scale
        params = jnp.stack([scale, shift, alpha32]).reshape(3, c_pad, 1)

    # ---- apply pass: out = PReLU(x * scale + shift), tiled elementwise -------
    out3 = pl.pallas_call(
        _br_apply_kernel,
        out_shape=jax.ShapeDtypeStruct((N, c_pad, hw_pad), x_nchw.dtype),
        grid_spec=pltpu.PrefetchScalarGridSpec(
            num_scalar_prefetch=0,
            grid=(c_grid, hw_grid),
            in_specs=[p_spec(3), x_spec],
            out_specs=x_spec,
        ),
        compiler_params=pltpu.CompilerParams(
            dimension_semantics=("parallel", "parallel"),
            vmem_limit_bytes=vmem_limit),
        cost_estimate=pl.CostEstimate(
            flops=4 * N * C * HW,
            transcendentals=0,
            bytes_accessed=2 * N * c_pad * hw_pad * itemsize + 12 * c_pad),
    )(params, x3)

    if c_pad != C or hw_pad != HW:
        out3 = out3[:, :C, :HW]
    return out3.reshape(N, C, H, W)


# -------------------- pure-JAX references (PyTorch semantics) ----------------
def _ref_br_train(x, gamma, beta, alpha, eps):
    mean = x.mean(axis=(0, 2, 3), keepdims=True)
    var = ((x - mean) ** 2).mean(axis=(0, 2, 3), keepdims=True)   # biased
    g = gamma.reshape(1, -1, 1, 1)
    b = beta.reshape(1, -1, 1, 1)
    a = alpha.reshape(1, -1, 1, 1)
    y = (x - mean) / jnp.sqrt(var + eps) * g + b
    return jnp.where(y >= 0, y, a * y)


def _ref_br_eval(x, gamma, beta, alpha, rmean, rvar, eps):
    m = rmean.reshape(1, -1, 1, 1)
    v = rvar.reshape(1, -1, 1, 1)
    g = gamma.reshape(1, -1, 1, 1)
    b = beta.reshape(1, -1, 1, 1)
    a = alpha.reshape(1, -1, 1, 1)
    y = (x - m) / jnp.sqrt(v + eps) * g + b
    return jnp.where(y >= 0, y, a * y)


if __name__ == "__main__":
    key = jax.random.PRNGKey(0)
    kx, kg, kb, ka, km, kv, kx2 = jax.random.split(key, 7)

    eps = 1e-3  # matches nn.BatchNorm2d(nOut, eps=0.001)

    # -------- test 1: aligned shape, training-mode + eval-mode forward -------
    N, C, H, W = 2, 16, 16, 16
    x = jax.random.normal(kx, (N, C, H, W), dtype=jnp.float32)
    gamma = 1.0 + 0.1 * jax.random.normal(kg, (C,), dtype=jnp.float32)
    beta = 0.1 * jax.random.normal(kb, (C,), dtype=jnp.float32)
    alpha = 0.25 + 0.05 * jax.random.normal(ka, (C,), dtype=jnp.float32)

    out = jax.block_until_ready(br_forward(x, gamma, beta, alpha, eps=eps))
    ref = _ref_br_train(x, gamma, beta, alpha, eps)
    assert out.shape == ref.shape == (N, C, H, W)
    assert jnp.allclose(out, ref, atol=1e-4, rtol=1e-4)

    rmean = 0.1 * jax.random.normal(km, (C,), dtype=jnp.float32)
    rvar = 1.0 + 0.1 * jax.random.uniform(kv, (C,), dtype=jnp.float32)
    out_e = jax.block_until_ready(
        br_forward(x, gamma, beta, alpha, eps=eps,
                   running_mean=rmean, running_var=rvar))
    ref_e = _ref_br_eval(x, gamma, beta, alpha, rmean, rvar, eps)
    assert jnp.allclose(out_e, ref_e, atol=1e-4, rtol=1e-4)

    # -------- test 2: ragged shape (C % 8 != 0, H*W % 128 != 0) --------------
    N2, C2, H2, W2 = 2, 12, 7, 7
    x2 = jax.random.normal(kx2, (N2, C2, H2, W2), dtype=jnp.float32)
    out2 = jax.block_until_ready(
        br_forward(x2, gamma[:C2], beta[:C2], alpha[:C2], eps=eps))
    ref2 = _ref_br_train(x2, gamma[:C2], beta[:C2], alpha[:C2], eps)
    assert out2.shape == ref2.shape == (N2, C2, H2, W2)
    assert jnp.allclose(out2, ref2, atol=1e-4, rtol=1e-4)

    # TODO(synk): BatchNorm's running-stat momentum update (a training-time
    # side effect that does not affect the returned output) is not implemented.
    print("KERNEL_OK")
</pallas_src>

<mosaic_0001>
module attributes {stable_mosaic.version = 11 : i64} {
  func.func @_br_stats_kernel(%arg0: i32, %arg1: i32, %arg2: memref<2x8x1xf32, #tpu.memory_space<vmem>>, %arg3: memref<2x8x256xf32, #tpu.memory_space<vmem>>, %arg4: memref<2x8x1xf32, #tpu.memory_space<vmem>>, %arg5: memref<1x8x1xf32, #tpu.memory_space<vmem>>, %arg6: memref<1x8x1xf32, #tpu.memory_space<vmem>>) attributes {dimension_semantics = [#tpu.dimension_semantics<parallel>, #tpu.dimension_semantics<arbitrary>], iteration_bounds = array<i64: 2, 1>, scalar_prefetch = 0 : i64, scratch_operands = 2 : i64, tpu.core_type = #tpu.core_type<tc>, window_params = [{transform_indices = @transform_0, window_bounds = array<i64: 2, 8, 1>}, {transform_indices = @transform_1, window_bounds = array<i64: 2, 8, 256>}, {transform_indices = @transform_2, window_bounds = array<i64: 2, 8, 1>}]} {
    %c0_i32 = arith.constant 0 : i32
    %0 = arith.cmpi eq, %arg1, %c0_i32 : i32
    %1 = arith.extui %0 : i1 to i32
    %c0_i32_0 = arith.constant 0 : i32
    %2 = arith.cmpi ne, %1, %c0_i32_0 : i32
    scf.if %2 {
      %cst_18 = arith.constant 0.000000e+00 : f32
      %18 = vector.broadcast %cst_18 : f32 to vector<1x8x1xf32>
      %c0_19 = arith.constant 0 : index
      %c0_20 = arith.constant 0 : index
      %c0_21 = arith.constant 0 : index
      %19 = vector.load %arg5[%c0_19, %c0_20, %c0_21] : memref<1x8x1xf32, #tpu.memory_space<vmem>>, vector<1x8x1xf32>
      tpu.vector_store %arg5[%c0_19, %c0_20, %c0_21], %18 {strides = array<i32>} : memref<1x8x1xf32, #tpu.memory_space<vmem>>, vector<1x8x1xf32>,
      %cst_22 = arith.constant 0.000000e+00 : f32
      %20 = vector.broadcast %cst_22 : f32 to vector<1x8x1xf32>
      %c0_23 = arith.constant 0 : index
      %c0_24 = arith.constant 0 : index
      %c0_25 = arith.constant 0 : index
      %21 = vector.load %arg6[%c0_23, %c0_24, %c0_25] : memref<1x8x1xf32, #tpu.memory_space<vmem>>, vector<1x8x1xf32>
      tpu.vector_store %arg6[%c0_23, %c0_24, %c0_25], %20 {strides = array<i32>} : memref<1x8x1xf32, #tpu.memory_space<vmem>>, vector<1x8x1xf32>,
    } else {
    }
    %c0 = arith.constant 0 : index
    %c0_1 = arith.constant 0 : index
    %c0_2 = arith.constant 0 : index
    %3 = vector.load %arg3[%c0, %c0_1, %c0_2] : memref<2x8x256xf32, #tpu.memory_space<vmem>>, vector<2x8x256xf32>
    %c0_3 = arith.constant 0 : index
    %c0_4 = arith.constant 0 : index
    %c0_5 = arith.constant 0 : index
    %4 = vector.load %arg5[%c0_3, %c0_4, %c0_5] : memref<1x8x1xf32, #tpu.memory_space<vmem>>, vector<1x8x1xf32>
    %cst = arith.constant dense<0.000000e+00> : vector<8xf32>
    %5 = vector.multi_reduction <add>, %3, %cst [0, 2] : vector<2x8x256xf32> to vector<8xf32>
    %6 = vector.shape_cast %5 : vector<8xf32> to vector<1x8x1xf32>
    %7 = arith.addf %4, %6 : vector<1x8x1xf32>
    %c0_6 = arith.constant 0 : index
    %c0_7 = arith.constant 0 : index
    %c0_8 = arith.constant 0 : index
    %8 = vector.load %arg5[%c0_6, %c0_7, %c0_8] : memref<1x8x1xf32, #tpu.memory_space<vmem>>, vector<1x8x1xf32>
    tpu.vector_store %arg5[%c0_6, %c0_7, %c0_8], %7 {strides = array<i32>} : memref<1x8x1xf32, #tpu.memory_space<vmem>>, vector<1x8x1xf32>,
    %c0_9 = arith.constant 0 : index
    %c0_10 = arith.constant 0 : index
    %c0_11 = arith.constant 0 : index
    %9 = vector.load %arg6[%c0_9, %c0_10, %c0_11] : memref<1x8x1xf32, #tpu.memory_space<vmem>>, vector<1x8x1xf32>
    %10 = arith.mulf %3, %3 : vector<2x8x256xf32>
    %cst_12 = arith.constant dense<0.000000e+00> : vector<8xf32>
    %11 = vector.multi_reduction <add>, %10, %cst_12 [0, 2] : vector<2x8x256xf32> to vector<8xf32>
    %12 = vector.shape_cast %11 : vector<8xf32> to vector<1x8x1xf32>
    %13 = arith.addf %9, %12 : vector<1x8x1xf32>
    %c0_13 = arith.constant 0 : index
    %c0_14 = arith.constant 0 : index
    %c0_15 = arith.constant 0 : index
    %14 = vector.load %arg6[%c0_13, %c0_14, %c0_15] : memref<1x8x1xf32, #tpu.memory_space<vmem>>, vector<1x8x1xf32>
    tpu.vector_store %arg6[%c0_13, %c0_14, %c0_15], %13 {strides = array<i32>} : memref<1x8x1xf32, #tpu.memory_space<vmem>>, vector<1x8x1xf32>,
    %c0_i32_16 = arith.constant 0 : i32
    %15 = arith.cmpi eq, %arg1, %c0_i32_16 : i32
    %16 = arith.extui %15 : i1 to i32
    %c0_i32_17 = arith.constant 0 : i32
    %17 = arith.cmpi ne, %16, %c0_i32_17 : i32
    scf.if %17 {
      %c0_18 = arith.constant 0 : index
      %c0_19 = arith.constant 0 : index
      %c0_20 = arith.constant 0 : index
      %18 = vector.load %arg5[%c0_18, %c0_19, %c0_20] : memref<1x8x1xf32, #tpu.memory_space<vmem>>, vector<1x8x1xf32>
      %cst_21 = arith.constant 0.001953125 : f32
      %19 = vector.broadcast %cst_21 : f32 to vector<1x8x1xf32>
      %20 = arith.mulf %18, %19 : vector<1x8x1xf32>
      %c0_22 = arith.constant 0 : index
      %c0_23 = arith.constant 0 : index
      %c0_24 = arith.constant 0 : index
      %21 = vector.load %arg6[%c0_22, %c0_23, %c0_24] : memref<1x8x1xf32, #tpu.memory_space<vmem>>, vector<1x8x1xf32>
      %cst_25 = arith.constant 0.001953125 : f32
      %22 = vector.broadcast %cst_25 : f32 to vector<1x8x1xf32>
      %23 = arith.mulf %21, %22 : vector<1x8x1xf32>
      %24 = arith.mulf %20, %20 : vector<1x8x1xf32>
      %25 = arith.subf %23, %24 : vector<1x8x1xf32>
      %cst_26 = arith.constant 0.000000e+00 : f32
      %26 = vector.broadcast %cst_26 : f32 to vector<1x8x1xf32>
      %27 = arith.maximumf %25, %26 : vector<1x8x1xf32>
      %c0_27 = arith.constant 0 : index
      %c0_28 = arith.constant 0 : index
      %c0_29 = arith.constant 0 : index
      %28 = vector.load %arg2[%c0_27, %c0_28, %c0_29] : memref<2x8x1xf32, #tpu.memory_space<vmem>>, vector<1x8x1xf32>
      %cst_30 = arith.constant 1.000000e-03 : f32
      %29 = vector.broadcast %cst_30 : f32 to vector<1x8x1xf32>
      %30 = arith.addf %27, %29 : vector<1x8x1xf32>
      %31 = math.rsqrt %30 : vector<1x8x1xf32>
      %32 = arith.mulf %28, %31 : vector<1x8x1xf32>
      %c1 = arith.constant 1 : index
      %c0_31 = arith.constant 0 : index
      %c0_32 = arith.constant 0 : index
      %33 = vector.load %arg2[%c1, %c0_31, %c0_32] : memref<2x8x1xf32, #tpu.memory_space<vmem>>, vector<1x8x1xf32>
      %34 = arith.mulf %20, %32 : vector<1x8x1xf32>
      %35 = arith.subf %33, %34 : vector<1x8x1xf32>
      %c0_33 = arith.constant 0 : index
      %c0_34 = arith.constant 0 : index
      %c0_35 = arith.constant 0 : index
      %36 = vector.load %arg4[%c0_33, %c0_34, %c0_35] : memref<2x8x1xf32, #tpu.memory_space<vmem>>, vector<1x8x1xf32>
      tpu.vector_store %arg4[%c0_33, %c0_34, %c0_35], %32 {strides = array<i32>} : memref<2x8x1xf32, #tpu.memory_space<vmem>>, vector<1x8x1xf32>,
      %c1_36 = arith.constant 1 : index
      %c0_37 = arith.constant 0 : index
      %c0_38 = arith.constant 0 : index
      %37 = vector.load %arg4[%c1_36, %c0_37, %c0_38] : memref<2x8x1xf32, #tpu.memory_space<vmem>>, vector<1x8x1xf32>
      tpu.vector_store %arg4[%c1_36, %c0_37, %c0_38], %35 {strides = array<i32>} : memref<2x8x1xf32, #tpu.memory_space<vmem>>, vector<1x8x1xf32>,
    } else {
    }
    return
  }
  func.func @transform_0(%arg0: i32, %arg1: i32) -> (i32, i32, i32) {
    %c0_i32 = arith.constant 0 : i32
    %c0_i32_0 = arith.constant 0 : i32
    %c0_i32_1 = arith.constant 0 : i32
    return %c0_i32, %arg0, %c0_i32_0 : i32, i32, i32
  }
  func.func @transform_1(%arg0: i32, %arg1: i32) -> (i32, i32, i32) {
    %c0_i32 = arith.constant 0 : i32
    %c0_i32_0 = arith.constant 0 : i32
    return %c0_i32, %arg0, %arg1 : i32, i32, i32
  }
  func.func @transform_2(%arg0: i32, %arg1: i32) -> (i32, i32, i32) {
    %c0_i32 = arith.constant 0 : i32
    %c0_i32_0 = arith.constant 0 : i32
    %c0_i32_1 = arith.constant 0 : i32
    return %c0_i32, %arg0, %c0_i32_0 : i32, i32, i32
  }
}

</mosaic_0001>

<bundles_post_ra>
// kernel: tpu_custom_call.1
= control target key start
LH: loop header
LB: loop body
LE: loop exit
PB: predicated region body
PF: predicated region fallthrough
CT: control target
= control target key end

     0   :  { %7 = vsyncpa [#allocation6], 0  ;;  %s743_s0 = inlined_call_operand.vmem [shape: f32[2,16,1], index: 0, kind: input, shape index: {}]   ;;  %s744_s1 = inlined_call_operand.hbm [shape: f32[2,16,256], index: 1, kind: input, shape index: {}]   ;;  %s745_s2 = inlined_call_operand.vmem [shape: f32[2,16,1], index: 2, kind: output, shape index: {}]  }
   0x1   :  { %9 = vsyncpa [#allocation6 + $0x1], 0  ;;  %s598_s9 = smov 0   ;;  %s600_s10 = smov 0  }
   0x2   :  { %s602_s11 = smov 0   ;;  %s604_s12 = smov 0  }
   0x3   :  { %s606_s13 = smov 0   ;;  %s608_s14 = smov 0  }
   0x4 LB: > { %s422_s15 = sadd.s32 4294967295, %s576_s14   ;;  %s27_s16 = sadd.s32 1, %s572_s13  ;;  %s576_s14 = sphi %s608_s14, %s15_s14   ;;  %s572_s13 = sphi %s606_s13, %s754_s13   ;;  %s568_s12 = sphi %s604_s12, %s753_s12   ;;  %s564_s11 = sphi %s602_s11, %s752_s11   ;;  %s560_s10 = sphi %s600_s10, %s751_s10   ;;  %s556_s9 = sphi %s598_s9, %s750_s9  }
   0x5   : > { %p29_p0 = scmp.ge.s32.totalorder %s27_s16, 2  ;;  %s34_s17 = sadd.s32 1, %s564_s11 }
   0x6   : > { %p41_p1 = scmp.ne.s32.totalorder %s564_s11, %s560_s10  ;;  %p42_p2 = scmp.eq.s32.totalorder %s576_s14, 0 }
   0x7   : > { %s756_s16 = smov (%p29_p0, %s27_s16), 0  ;;  %p75_p4 = scmp.ne.s32.totalorder %s560_s10, %s556_s9 }
   0x8   : > { %p634_p3 = por %p42_p2, %p41_p1  ;;  %s31_s19 = ssub.s32 %s572_s13, %s756_s16 }
   0x9   : > { %p76_p5 = scmp.eq.s32.totalorder %s422_s15, 0  ;;  %p32_p6 = scmp.eq.s32.totalorder %s31_s19, 0 }
   0xa   : > { %p99_p7 = scmp.eq.s32.totalorder %s422_s15, 1  ;;  %p425_p10 = scmp.ge.s32.totalorder %s576_s14, 2 }
   0xb   : > { %p641_p8 = por %p76_p5, %p75_p4 }
   0xc   : > { %s646_s21 = scalar_select %p32_p6, %s564_s11, %s34_s17  }
   0xd   : > { %p648_p9 = por %p99_p7, %p41_p1  ;;  %121 = sbr.rel (%p425_p10) target bundleno = 54 (0x36), region = 16 }
   0xf   : > { %s748_s22 = scalar_select %p648_p9, 1, 0 }
  0x14   : > { %124 = sbr.rel (!%p634_p3) target bundleno = 27 (0x1b), region = 20  ;;  %s126_s23 = sand.u32 (%p634_p3), 1, %s564_s11  }
  0x15   : > { %s427_s24 = sshll.u32 (%p634_p3), %s572_s13, 3  ;;  %s426_s25 = sshll.u32 (%p634_p3), %s126_s23, 4 }
  0x16   : > { %s130_s28 = scalar_lea.vmem (%p634_p3), %s743_s0, %s427_s24  ;;  %s128_s29 = scalar_lea.vmem (%p634_p3), [#allocation4], %s426_s25 }
  0x17   : > { %v160_v0 = vld [vmem:[%s130_s28] sm:$0xff] (%p634_p3)  ;;  %v162_v1 = vld [vmem:[%s130_s28 + $0x10] sm:$0xff] (%p634_p3) }
  0x18   : > { %161 = vst [vmem:[%s128_s29] sm:$0xff] (%p634_p3), %v160_v0  ;;  %163 = vst [vmem:[%s128_s29 + $0x8] sm:$0xff] (%p634_p3), %v162_v1 }
  0x1b PF: > { %s170_s30 = sand.u32 1, %s564_s11   ;;  %s441_s3 = sshll.u32 %s572_s13, 8 }
  0x1c   : > { %s428_s4 = sshll.u32 %s170_s30, 5  ;;  %s665_s7 = scalar_lea.hbm %s744_s1, %s441_s3 }
  0x1d   : > { %s174_s8 = scalar_lea.vmem [#allocation5], %s428_s4  ;;  %s669_s15 = scalar_lea.sflag [#allocation6], %s170_s30 }
  0x1e   : > { %s183_s9 = sshll.u32 %s174_s8, 4  ;;  %s498_s17 = scalar_lea.hbm %s665_s7, 512  ;;  %s667_s9 = int_to_ptr.vmem [resolvable:$true] %s183_s9 }
  0x1f   : > { %p499_p11 = scmp.ne.s32.totalorder %s665_s7, %s498_s17  ;;  %s502_s24 = scalar_lea.hbm %s744_s1, 1024 }
  0x20   : > { %p503_p0 = scmp.lt.u32.totalorder %s665_s7, %s744_s1  ;;  %p504_p1 = scmp.lt.u32.totalorder %s502_s24, %s498_s17 }
  0x21   : > { %p500_p12 = pnand %p499_p11, %p634_p3  ;;  %p506_p4 = scmp.lt.u32.totalorder %s498_s17, %s665_s7 }
  0x22   : > { %p505_p2 = por %p504_p1, %p503_p0 }
  0x23   : > { %p501_p13 = pneg %p500_p12 }
  0x24   : > { %p507_p5 = por %p506_p4, %p505_p2 }
  0x26   : > { %p508_p6 = pnand %p507_p5, %p501_p13 }
  0x28   : > { %511 = shalt.err (!%p508_p6)
}
  0x29   : > { %s512_s27 = scalar_lea.vmem %s667_s9, 512  ;;  %s578_s28 = smov [#allocation5]  }
  0x2a   : > { %p513_p7 = scmp.ne.s32.totalorder %s667_s9, %s512_s27  ;;  %s516_s29 = sshll.u32 %s578_s28, 4  ;;  %s517_s29 = int_to_ptr.vmem [resolvable:$false] %s516_s29 }
  0x2b   : > { %s518_s30 = scalar_lea.vmem %s517_s29, 1024  ;;  %p519_p12 = scmp.lt.s32.totalorder %s667_s9, %s517_s29 }
  0x2c   : > { %p514_p10 = pnand %p513_p7, %p634_p3  ;;  %p520_p9 = scmp.lt.s32.totalorder %s518_s30, %s512_s27 }
  0x2e   : > { %p515_p11 = pneg %p514_p10  ;;  %p521_p0 = por %p520_p9, %p519_p12 }
  0x30   : > { %p522_p1 = pnand %p521_p0, %p515_p11 }
  0x32   : > { %525 = shalt.err (!%p522_p1)
}
  0x33   : > { %s579_s3 = smov 512   ;;  %s580_s4 = smov 256  }
  0x34   : > { %s581_s5 = smov 16  }
  0x35   : > { %442 = dma.hbm_to_vmem [thread:$0]  (%p634_p3), %s665_s7, 512, %s667_s9, %s669_s15, %s579_s3, %s580_s4, %s581_s5  }
  0x36 PF: > { %p431_p13 = scmp.ge.s32.totalorder %s576_s14, 1  ;;  %p191_p2 = scmp.lt.s32.totalorder %s576_s14, 3 }
  0x38   : > { %p192_p4 = pnand %p431_p13, %p191_p2 }
  0x39   : > { %s696_s6 = sand.u32 (!%p192_p4), 1, %s560_s10  }
  0x3a   : > { %195 = sbr.rel (%p192_p4) target bundleno = 263 (0x107), region = 62  ;;  %s432_s8 = sshll.u32 (!%p192_p4), %s696_s6, 4 }
  0x3b   : > { %s433_s17 = sshll.u32 (!%p192_p4), %s696_s6, 5  ;;  %s702_s18 = scalar_lea.vmem (!%p192_p4), [#allocation4], %s432_s8 }
  0x3c   : > { %s205_s7 = scalar_lea.sflag (!%p192_p4), [#allocation6], %s696_s6  ;;  %s208_s9 = scalar_lea.vmem (!%p192_p4), [#allocation5], %s433_s17 }
  0x41   : > { %551 = dma.done.wait (%p641_p8), %s205_s7, 512  }
  0x42   : > { %553 = vsyncadd (%p641_p8), %s205_s7, 4294966784  ;;  %vm237_vm0 = vcmask 7168   ;;  %v582_v2 = vmov 0.0   ;;  %v240_v3 = vld [vmem:[%s208_s9] sm:$0xff]  ;;  %v241_v4 = vld [vmem:[%s208_s9 + $0x8] sm:$0xff]  ;;  %s231_s20 = scalar_lea.vmem [#allocation7], %s432_s8 }
  0x43   : > { %238 = vst.msk [vmem:[#allocation2] sm:$0xff] %vm237_vm0, %v582_v2  ;;  %239 = vst.msk [vmem:[#allocation3] sm:$0xff] %vm237_vm0, %v582_v2  ;;  %v242_v5 = vld [vmem:[%s208_s9 + $0x10] sm:$0xff]  ;;  %v245_v6 = vadd.f32 %v241_v4, %v240_v3  ;;  %v254_v7 = vmul.f32 %v240_v3, %v240_v3  ;;  %v255_v8 = vmul.f32 %v241_v4, %v241_v4  ;;  %v243_v10 = vld [vmem:[%s208_s9 + $0x18] sm:$0xff]  ;;  %p749_p3 = scmp.ne.s32.totalorder %s748_s22, 0 }
  0x44   : > { %v256_v9 = vmul.f32 %v242_v5, %v242_v5  ;;  %v257_v12 = vmul.f32 %v243_v10, %v243_v10  ;;  %v275_v31 = vld [vmem:[%s702_s18] sm:$0xff]  ;;  %v435_v34 = vld [vmem:[%s702_s18 + $0x8] sm:$0xff]  ;;  %s438_s15 = sshll.u32 (%p749_p3), %s568_s12, 3 }
  0x45   : > { %v246_v11 = vadd.f32 %v245_v6, %v242_v5  ;;  %v258_v13 = vadd.f32 %v255_v8, %v254_v7  ;;  %s294_s24 = scalar_lea.vmem (%p749_p3), %s745_s2, %s438_s15 }
  0x47   : > { %v247_v14 = vadd.f32 %v246_v11, %v243_v10  ;;  %v259_v15 = vadd.f32 %v258_v13, %v256_v9 }
  0x49   : > { %248 = vadd.xlane.f32.xlu0 %v247_v14  ;;  %v260_v16 = vadd.f32 %v259_v15, %v257_v12 }
  0x4a   : > { %v244_v17 = vld [vmem:[#allocation2] sm:$0xff]  ;;  %v253_v20 = vld [vmem:[#allocation3] sm:$0xff] }
  0x4d   : > { %261 = vadd.xlane.f32.xlu0 %v260_v16 }
  0xd6   : > { %v249_v18 = vpop.xlane.xlu0 %248 }
  0xd7   : > { %v250_v19 = vadd.f32 %v249_v18, %v244_v17 }
  0xd9   : > { %252 = vst.msk [vmem:[#allocation2] sm:$0xff] %vm237_vm0, %v250_v19 }
  0xda   : > { %v262_v21 = vpop.xlane.xlu0 %261 }
  0xdb   : > { %v263_v22 = vadd.f32 %v262_v21, %v253_v20 }
  0xdd   : > { %264 = vst.msk [vmem:[#allocation3] sm:$0xff] %vm237_vm0, %v263_v22 }
  0xe0   : > { %v268_v23 = vld [vmem:[#allocation2] sm:$0xff] }
  0xe1   : > { %v269_v24 = vmul.f32 0.001953125, %v268_v23 }
  0xe3   : > { %v272_v26 = vmul.f32 %v269_v24, %v269_v24 }
  0xe4   : > { %v270_v25 = vld [vmem:[#allocation3] sm:$0xff] }
  0xe5   : > { %v271_v27 = vmul.f32 0.001953125, %v270_v25 }
  0xe7   : > { %v273_v28 = vsub.f32 %v271_v27, %v272_v26 }
  0xe9   : > { %v274_v29 = vmax.f32 %v273_v28, 0.0 }
  0xeb   : > { %v276_v30 = vadd.f32 0.001, %v274_v29 }
  0xed   : > { %496 = vrsqrt.f32 %v276_v30 }
  0xf7   : > { %v497_v32 = vpop.eup %496 }
  0xf8   : > { %v278_v33 = vmul.f32 %v497_v32, %v275_v31  ;;  %292 = sbr.rel (!%p749_p3) target bundleno = 263 (0x107), region = 82 }
  0xfa   : > { %v281_v35 = vmul.f32 %v278_v33, %v269_v24  ;;  %283 = vst.msk [vmem:[%s231_s20] sm:$0xff] %vm237_vm0, %v278_v33 }
  0xfc   : > { %v282_v36 = vsub.f32 %v435_v34, %v281_v35 }
  0xfe   : > { %436 = vst.msk [vmem:[%s231_s20 + $0x8] sm:$0xff] %vm237_vm0, %v282_v36 }
 0x101   : > { %v324_v37 = vld [vmem:[%s231_s20] sm:$0xff] }
 0x102   : > { %325 = vst [vmem:[%s294_s24] sm:$0xff] %v324_v37 }
 0x105   : > { %v326_v38 = vld [vmem:[%s231_s20 + $0x8] sm:$0xff] }
 0x106   : > { %327 = vst [vmem:[%s294_s24 + $0x10] sm:$0xff] %v326_v38 }
 0x107 PF: > { %s15_s14 = sadd.s32 1, %s576_s14   ;;  %s750_s9 = smov %s560_s10 }
 0x108   : > { %p12_p8 = scmp.ge.s32.totalorder %s15_s14, 4   ;;  %s751_s10 = smov %s564_s11 }
 0x109   : > { %s752_s11 = smov %s646_s21  ;;  %s753_s12 = smov %s572_s13 }
 0x10a   : > { %s754_s13 = smov %s756_s16  ;;  %14 = sbr.rel (!%p12_p8) target bundleno = 4 (0x4), region = 162 }
 0x111   :  { %343 = vsyncpa [#allocation6], 1 }
 0x112   :  { %345 = vsyncpa [#allocation6 + $0x1], 1 }

</bundles_post_ra>
